<compile_context>
chip_gen: v6e
topology: v6e:2x2x1
jax: 0.10.0
libtpu: 0.0.40
codegen_flags: <defaults>
</compile_context>

<pallas_src>
import functools

import jax
import jax.numpy as jnp
from jax.experimental import pallas as pl
from jax.experimental.pallas import tpu as pltpu

LANE = 128
ROW = 16  # bf16 min row granularity (2 rows per sublane)


def _round_up(x, m):
    return (x + m - 1) // m * m


def residual_block_kernel(x_ref, wf_ref, bf_ref, w2_ref, b2_ref, o_ref, *, p, q):
    # Cast x f32 -> bf16 in-kernel (rides the VPU slot, avoids a wrapper-side pass).
    x = x_ref[...].astype(wf_ref.dtype)                          # (TILE_B, in) bf16

    # Fused match_dim + fc1: one lane-dense (TILE_B, 2P) MXU pass over x, f32 accumulate.
    fused = jnp.dot(x, wf_ref[...],
                    preferred_element_type=jnp.float32) + bf_ref[...]
    residual = fused[:, :p]                                      # match_dim(x)   (f32)
    h = jnp.maximum(fused[:, p:], 0.0)                           # relu(fc1(x))   (f32)

    # fc2 on the MXU. Column `q` of W2/b2 carries the folded attention projection,
    # so `out[:, q]` is the attention logit (padded lanes of h are exactly zero).
    out = jnp.dot(h.astype(w2_ref.dtype), w2_ref[...],
                  preferred_element_type=jnp.float32) + b2_ref[...]

    attn = jax.nn.sigmoid(out[:, q:q + 1])                       # (TILE_B, 1), EUP

    # out * attn + residual, stored lane-dense in bf16 (wrapper slices off lanes >= q).
    o_ref[...] = (out * attn + residual).astype(o_ref.dtype)


def prepare_params(params, in_features, out_features, compute_dtype=jnp.bfloat16):
    """Pad/fuse/transpose/cast PyTorch-style params into kernel layout."""
    # Lane-dense width with at least one spare column reserved for the attention logit.
    p = _round_up(out_features + 1, LANE)

    def pad2(a, rows, cols):
        return jnp.zeros((rows, cols), jnp.float32).at[:a.shape[0], :a.shape[1]].set(a)

    wm = pad2(params["wm"], in_features, p)
    w1 = pad2(params["w1"], in_features, p)
    bm = pad2(params["bm"], 1, p)
    b1 = pad2(params["b1"], 1, p)

    # Fold attention.attn into fc2's spare column `out_features`:
    #   out[:, :of] = h @ W2 + b2
    #   out[:, of]  = (h @ W2 + b2) @ wa + ba      (the attention logit)
    w2a = params["w2"] @ params["wa"]                            # (of, 1)
    b2a = params["b2"] @ params["wa"] + params["ba"]             # (1, 1)
    w2 = pad2(jnp.concatenate([params["w2"], w2a], axis=1), p, p)
    b2 = pad2(jnp.concatenate([params["b2"], b2a], axis=1), 1, p)

    wf = jnp.concatenate([wm, w1], axis=1).astype(compute_dtype)  # (in, 2P) fused Wm|W1
    bf = jnp.concatenate([bm, b1], axis=1)                        # (1, 2P)  f32
    return dict(wf=wf, bf=bf, w2=w2.astype(compute_dtype), b2=b2, p=p)


def residual_block(x, params, in_features, out_features, *,
                   tile_b=1024, compute_dtype=jnp.bfloat16, out_dtype=jnp.bfloat16):
    """x: (B, in_features) float32. params: dict from init_params."""
    B = x.shape[0]
    kp = prepare_params(params, in_features, out_features, compute_dtype)
    p = kp["p"]

    # Batch tiling: 16-row granularity (bf16), and >=2 grid steps when the batch is big
    # enough so dimension_semantics=("parallel",) shards across both TCs on v7x.
    b_min = _round_up(B, ROW)
    tile_b = max(ROW, _round_up(min(tile_b, b_min), ROW))
    if tile_b >= b_min and b_min >= 2 * ROW:
        tile_b = _round_up(pl.cdiv(b_min, 2), ROW)
    b_pad = _round_up(B, tile_b)

    if b_pad != B:
        x = jnp.zeros((b_pad, in_features), x.dtype).at[:B].set(x)

    # Explicit VMEM limit derived from the actual footprint (double-buffered x / out
    # tiles, resident weights x2 buffers, f32 intermediates) with 2x headroom.
    def nbytes(a):
        return int(a.size) * a.dtype.itemsize
    footprint = (
        2 * tile_b * in_features * x.dtype.itemsize                 # x tiles (f32)
        + 2 * tile_b * p * jnp.dtype(out_dtype).itemsize            # out tiles
        + 2 * (nbytes(kp["wf"]) + nbytes(kp["bf"])
               + nbytes(kp["w2"]) + nbytes(kp["b2"]))               # resident weights
        + tile_b * (2 * p + 2 * p) * 4                              # f32 intermediates
    )
    vmem_limit = min(2 * footprint + (4 << 20), 32 << 20)

    grid = (b_pad // tile_b,)
    kernel = functools.partial(residual_block_kernel, p=p, q=out_features)

    out = pl.pallas_call(
        kernel,
        out_shape=jax.ShapeDtypeStruct((b_pad, p), out_dtype),
        grid_spec=pltpu.PrefetchScalarGridSpec(
            num_scalar_prefetch=0,
            grid=grid,
            in_specs=[
                pl.BlockSpec((tile_b, in_features), lambda i: (i, 0)),  # x (streamed)
                pl.BlockSpec((in_features, 2 * p), lambda i: (0, 0)),   # fused Wm|W1
                pl.BlockSpec((1, 2 * p), lambda i: (0, 0)),             # fused bm|b1
                pl.BlockSpec((p, p), lambda i: (0, 0)),                 # W2 (+ logit col)
                pl.BlockSpec((1, p), lambda i: (0, 0)),                 # b2 (+ logit col)
            ],
            out_specs=pl.BlockSpec((tile_b, p), lambda i: (i, 0)),
        ),
        compiler_params=pltpu.CompilerParams(
            dimension_semantics=("parallel",),          # shard batch across TCs (v7x)
            vmem_limit_bytes=int(vmem_limit),
        ),
    )(x, kp["wf"], kp["bf"], kp["w2"], kp["b2"])

    # TODO(synk): downstream consumers could read the padded (B, P) bf16 layout directly
    # and skip this slice pass entirely.
    return out[:B, :out_features]


def init_params(key, in_features, out_features):
    """Deterministic init mimicking nn.Linear default (uniform(-1/sqrt(fan_in), +)).
    Weights are stored pre-transposed as (fan_in, fan_out), biases as (1, fan_out)."""
    ks = jax.random.split(key, 8)

    def lin(kw, kb, fan_in, fan_out):
        bound = 1.0 / jnp.sqrt(jnp.float32(fan_in))
        w = jax.random.uniform(kw, (fan_in, fan_out), jnp.float32, -bound, bound)
        b = jax.random.uniform(kb, (1, fan_out), jnp.float32, -bound, bound)
        return w, b

    wm, bm = lin(ks[0], ks[1], in_features, out_features)    # match_dim
    w1, b1 = lin(ks[2], ks[3], in_features, out_features)    # fc1
    w2, b2 = lin(ks[4], ks[5], out_features, out_features)   # fc2
    wa, ba = lin(ks[6], ks[7], out_features, 1)              # attention.attn
    return dict(wm=wm, bm=bm, w1=w1, b1=b1, w2=w2, b2=b2, wa=wa, ba=ba)


def reference(x, p):
    """Pure-JAX f32 reference of the PyTorch forward, for a correctness check."""
    residual = x @ p["wm"] + p["bm"]
    h = jnp.maximum(x @ p["w1"] + p["b1"], 0.0)
    out = h @ p["w2"] + p["b2"]
    attn = jax.nn.sigmoid(out @ p["wa"] + p["ba"])
    return out * attn + residual


if __name__ == "__main__":
    B, in_features, out_features = 8, 16, 32

    key = jax.random.PRNGKey(0)
    k_x, k_p = jax.random.split(key)
    x = jax.random.normal(k_x, (B, in_features), jnp.float32)
    params = init_params(k_p, in_features, out_features)

    out = residual_block(x, params, in_features, out_features)
    out = jax.block_until_ready(out)

    ref = reference(x, params)
    assert out.shape == (B, out_features)
    # Tolerance relaxed vs. the pure-f32 reference because MXU inputs and the stored
    # output are bf16 (f32 accumulation, f32 elementwise epilogue).
    assert jnp.allclose(out.astype(jnp.float32), ref, atol=5e-2, rtol=5e-2), \
        "mismatch vs reference"

    print("KERNEL_OK")
</pallas_src>

<mosaic_0001>
module attributes {stable_mosaic.version = 11 : i64} {
  func.func @residual_block_kernel(%arg0: i32, %arg1: memref<16x16xf32, #tpu.memory_space<vmem>>, %arg2: memref<16x256xbf16, #tpu.memory_space<vmem>>, %arg3: memref<1x256xf32, #tpu.memory_space<vmem>>, %arg4: memref<128x128xbf16, #tpu.memory_space<vmem>>, %arg5: memref<1x128xf32, #tpu.memory_space<vmem>>, %arg6: memref<16x128xbf16, #tpu.memory_space<vmem>>) attributes {dimension_semantics = [#tpu.dimension_semantics<parallel>], iteration_bounds = array<i64: 1>, scalar_prefetch = 0 : i64, scratch_operands = 0 : i64, tpu.core_type = #tpu.core_type<tc>, window_params = [{transform_indices = @transform_0, window_bounds = array<i64: 16, 16>}, {pipeline_mode = #tpu.pipeline_mode<synchronous>, transform_indices = @transform_1, window_bounds = array<i64: 16, 256>}, {pipeline_mode = #tpu.pipeline_mode<synchronous>, transform_indices = @transform_2, window_bounds = array<i64: 1, 256>}, {pipeline_mode = #tpu.pipeline_mode<synchronous>, transform_indices = @transform_3, window_bounds = array<i64: 128, 128>}, {pipeline_mode = #tpu.pipeline_mode<synchronous>, transform_indices = @transform_4, window_bounds = array<i64: 1, 128>}, {transform_indices = @transform_5, window_bounds = array<i64: 16, 128>}]} {
    %c0 = arith.constant 0 : index
    %c0_0 = arith.constant 0 : index
    %0 = vector.load %arg1[%c0, %c0_0] : memref<16x16xf32, #tpu.memory_space<vmem>>, vector<16x16xf32>
    %1 = arith.truncf %0 : vector<16x16xf32> to vector<16x16xbf16>
    %c0_1 = arith.constant 0 : index
    %c0_2 = arith.constant 0 : index
    %2 = vector.load %arg2[%c0_1, %c0_2] : memref<16x256xbf16, #tpu.memory_space<vmem>>, vector<16x256xbf16>
    %cst = arith.constant dense<0.000000e+00> : vector<16x256xf32>
    %3 = tpu.matmul %1, %2, %cst {dimension_numbers = #tpu.dot_dimension_numbers<[1], [0], [0], [1], [0, 0, 1, 1], [], []>} : vector<16x16xbf16>, vector<16x256xbf16>, vector<16x256xf32> -> vector<16x256xf32>
    %c0_3 = arith.constant 0 : index
    %c0_4 = arith.constant 0 : index
    %4 = vector.load %arg3[%c0_3, %c0_4] : memref<1x256xf32, #tpu.memory_space<vmem>>, vector<1x256xf32>
    %5 = vector.broadcast %4 : vector<1x256xf32> to vector<16x256xf32>
    %6 = arith.addf %3, %5 : vector<16x256xf32>
    %7 = vector.extract_strided_slice %6 {offsets = [0, 0], sizes = [16, 128], strides = [1, 1]} : vector<16x256xf32> to vector<16x128xf32>
    %8 = vector.extract_strided_slice %6 {offsets = [0, 128], sizes = [16, 128], strides = [1, 1]} : vector<16x256xf32> to vector<16x128xf32>
    %cst_5 = arith.constant 0.000000e+00 : f32
    %9 = vector.broadcast %cst_5 : f32 to vector<16x128xf32>
    %10 = arith.maximumf %8, %9 : vector<16x128xf32>
    %11 = arith.truncf %10 : vector<16x128xf32> to vector<16x128xbf16>
    %c0_6 = arith.constant 0 : index
    %c0_7 = arith.constant 0 : index
    %12 = vector.load %arg4[%c0_6, %c0_7] : memref<128x128xbf16, #tpu.memory_space<vmem>>, vector<128x128xbf16>
    %cst_8 = arith.constant dense<0.000000e+00> : vector<16x128xf32>
    %13 = tpu.matmul %11, %12, %cst_8 {dimension_numbers = #tpu.dot_dimension_numbers<[1], [0], [0], [1], [0, 0, 1, 1], [], []>} : vector<16x128xbf16>, vector<128x128xbf16>, vector<16x128xf32> -> vector<16x128xf32>
    %c0_9 = arith.constant 0 : index
    %c0_10 = arith.constant 0 : index
    %14 = vector.load %arg5[%c0_9, %c0_10] : memref<1x128xf32, #tpu.memory_space<vmem>>, vector<1x128xf32>
    %15 = vector.broadcast %14 : vector<1x128xf32> to vector<16x128xf32>
    %16 = arith.addf %13, %15 : vector<16x128xf32>
    %17 = vector.extract_strided_slice %16 {offsets = [0, 32], sizes = [16, 1], strides = [1, 1]} : vector<16x128xf32> to vector<16x1xf32>
    %18 = arith.negf %17 : vector<16x1xf32>
    %19 = math.exp %18 : vector<16x1xf32>
    %cst_11 = arith.constant 1.000000e+00 : f32
    %20 = vector.broadcast %cst_11 : f32 to vector<16x1xf32>
    %21 = arith.addf %20, %19 : vector<16x1xf32>
    %22 = arith.divf %20, %21 : vector<16x1xf32>
    %23 = vector.broadcast %22 : vector<16x1xf32> to vector<16x128xf32>
    %24 = arith.mulf %16, %23 : vector<16x128xf32>
    %25 = arith.addf %24, %7 : vector<16x128xf32>
    %26 = arith.truncf %25 : vector<16x128xf32> to vector<16x128xbf16>
    %c0_12 = arith.constant 0 : index
    %c0_13 = arith.constant 0 : index
    %27 = vector.load %arg6[%c0_12, %c0_13] : memref<16x128xbf16, #tpu.memory_space<vmem>>, vector<16x128xbf16>
    tpu.vector_store %arg6[%c0_12, %c0_13], %26 {strides = array<i32>} : memref<16x128xbf16, #tpu.memory_space<vmem>>, vector<16x128xbf16>,
    return
  }
  func.func @transform_0(%arg0: i32) -> (i32, i32) {
    %c0_i32 = arith.constant 0 : i32
    %c0_i32_0 = arith.constant 0 : i32
    return %arg0, %c0_i32 : i32, i32
  }
  func.func @transform_1(%arg0: i32) -> (i32, i32) {
    %c0_i32 = arith.constant 0 : i32
    %c0_i32_0 = arith.constant 0 : i32
    %c0_i32_1 = arith.constant 0 : i32
    return %c0_i32, %c0_i32_0 : i32, i32
  }
  func.func @transform_2(%arg0: i32) -> (i32, i32) {
    %c0_i32 = arith.constant 0 : i32
    %c0_i32_0 = arith.constant 0 : i32
    %c0_i32_1 = arith.constant 0 : i32
    return %c0_i32, %c0_i32_0 : i32, i32
  }
  func.func @transform_3(%arg0: i32) -> (i32, i32) {
    %c0_i32 = arith.constant 0 : i32
    %c0_i32_0 = arith.constant 0 : i32
    %c0_i32_1 = arith.constant 0 : i32
    return %c0_i32, %c0_i32_0 : i32, i32
  }
  func.func @transform_4(%arg0: i32) -> (i32, i32) {
    %c0_i32 = arith.constant 0 : i32
    %c0_i32_0 = arith.constant 0 : i32
    %c0_i32_1 = arith.constant 0 : i32
    return %c0_i32, %c0_i32_0 : i32, i32
  }
  func.func @transform_5(%arg0: i32) -> (i32, i32) {
    %c0_i32 = arith.constant 0 : i32
    %c0_i32_0 = arith.constant 0 : i32
    return %arg0, %c0_i32 : i32, i32
  }
}

</mosaic_0001>

<bundles_post_ra>
// kernel: tpu_custom_call.1
= control target key start
LH: loop header
LB: loop body
LE: loop exit
PB: predicated region body
PF: predicated region fallthrough
CT: control target
= control target key end

     0   :  { %10 = vsyncpa [#allocation3], 0  ;;  %s542_s0 = inlined_call_operand.hbm [shape: f32[16,16], index: 0, kind: input, shape index: {}]   ;;  %s543_s1 = inlined_call_operand.hbm [shape: bf16[16,256], index: 1, kind: input, shape index: {}]   ;;  %s544_s2 = inlined_call_operand.vmem [shape: f32[1,256], index: 2, kind: input, shape index: {}]   ;;  %s545_s3 = inlined_call_operand.hbm [shape: bf16[128,128], index: 3, kind: input, shape index: {}]   ;;  %s546_s4 = inlined_call_operand.vmem [shape: f32[1,128], index: 4, kind: input, shape index: {}]   ;;  %s547_s5 = inlined_call_operand.hbm [shape: bf16[16,128], index: 5, kind: output, shape index: {}]  }
   0x1   :  { %11 = vsyncpa [#allocation6], 0 }
   0x2   :  { %12 = vsyncpa [#allocation4], 0  ;;  %s476_s18 = smov [#allocation5]   ;;  %s477_s20 = smov [#allocation2]  }
   0x3   :  { %s30_s19 = sshll.u32 %s476_s18, 4  ;;  %s18_s21 = sshll.u32 %s477_s20, 4  ;;  %s31_s19 = int_to_ptr.vmem [resolvable:$true] %s30_s19  ;;  %s19_s21 = int_to_ptr.vmem [resolvable:$true] %s18_s21 }
   0x4   :  { %s398_s22 = scalar_lea.vmem %s31_s19, 256  ;;  %p403_p1 = scmp.lt.s32.totalorder %s31_s19, %s31_s19 }
   0x5   :  { %p399_p0 = scmp.ne.s32.totalorder %s31_s19, %s398_s22  ;;  %p404_p2 = scmp.lt.s32.totalorder %s398_s22, %s398_s22 }
   0x7   :  { %p405_p3 = por %p404_p2, %p403_p1 }
   0x9   :  { %p406_p4 = pnand %p405_p3, %p399_p0 }
   0xb   :  { %409 = shalt.err (!%p406_p4)
}
   0xc   :  { %s478_s23 = smov 128   ;;  %s479_s24 = smov 8  }
   0xd   :  { %36 = dma.hbm_to_vmem [thread:$0]  %s543_s1, 256, %s31_s19, [#allocation6], %s478_s23, %s478_s23, %s479_s24  }
   0xe   :  { %s418_s27 = scalar_lea.vmem %s19_s21, 256  ;;  %p423_p6 = scmp.lt.s32.totalorder %s19_s21, %s19_s21 }
   0xf   :  { %p419_p5 = scmp.ne.s32.totalorder %s19_s21, %s418_s27  ;;  %p424_p7 = scmp.lt.s32.totalorder %s418_s27, %s418_s27 }
  0x11   :  { %p425_p8 = por %p424_p7, %p423_p6 }
  0x13   :  { %p426_p9 = pnand %p425_p8, %p419_p5 }
  0x15   :  { %429 = shalt.err (!%p426_p9)
}
  0x16   :  { %24 = dma.hbm_to_vmem [thread:$0]  %s542_s0, 256, %s19_s21, [#allocation3], %s478_s23, %s478_s23, %s479_s24  }
  0x17   :  { %s480_s30 = smov [#allocation7]  }
  0x18   :  { %s44_s6 = sshll.u32 %s480_s30, 4  ;;  %s45_s6 = int_to_ptr.vmem [resolvable:$true] %s44_s6 }
  0x19   :  { %s438_s7 = scalar_lea.vmem %s45_s6, 1024  ;;  %p443_p11 = scmp.lt.s32.totalorder %s45_s6, %s45_s6 }
  0x1a   :  { %p439_p10 = scmp.ne.s32.totalorder %s45_s6, %s438_s7  ;;  %p444_p12 = scmp.lt.s32.totalorder %s438_s7, %s438_s7 }
  0x1c   :  { %p445_p13 = por %p444_p12, %p443_p11 }
  0x1e   :  { %p446_p0 = pnand %p445_p13, %p439_p10 }
  0x20   :  { %449 = shalt.err (!%p446_p0)
}
  0x21   :  { %s481_s1 = smov 64   ;;  %s482_s8 = smov 4  }
  0x22   :  { %50 = dma.hbm_to_vmem [thread:$0]  %s545_s3, 1024, %s45_s6, [#allocation6], %s481_s1, %s481_s1, %s482_s8  }
  0x23   :  { %470 = dma.done.wait [#allocation3], 256  }
  0x24   :  { %471 = vsyncadd [#allocation3], 4294967040 }
  0x25   :  { %472 = dma.done.wait [#allocation6], 1280  }
  0x26   :  { %473 = vsyncadd [#allocation6], 4294966016  ;;  %v483_v0 = vmov 0   ;;  %v484_v1 = vmov 0.0   ;;  %v371_v2 = vld [vmem:[#allocation5 + $0x4] ss:$8 sps:$4 sm:$0xff]   ;;  %v70_v15 = vlaneseq }
  0x27   :  { %126 = vmatprep.mubr.bf16.mxu0 %v483_v0  ;;  %338 = vmatprep.subr.bf16.mxu1 %v484_v1  ;;  %v373_v3 = vld [vmem:[#allocation5] ss:$8 sps:$4 sm:$0xff]   ;;  %v63_v4 = vld [vmem:[#allocation2] sm:$0xff]  ;;  %v64_v5 = vld [vmem:[#allocation2 + $0x8] sm:$0xff]  ;;  %vm90_vm0 = vcmask 130048   ;;  %vm485_vm1 = vmmov 0  }
  0x28   :  { %108 = vmatprep.subr.bf16.mxu0 %v371_v2  ;;  %v65_v6 = vpack.c.bf16 %v64_v5, %v63_v4  ;;  %v374_v7 = vld [vmem:[#allocation7 + $0x38] sm:$0xff]   ;;  %v375_v8 = vld [vmem:[#allocation7 + $0x30] sm:$0xff]   ;;  %v376_v9 = vld [vmem:[#allocation7 + $0x28] sm:$0xff]   ;;  %354 = vmatprep.mubr.msk.bf16.mxu1 %vm485_vm1, %v484_v1  ;;  %v71_v16 = vshrl.u32 %v70_v15, 7  ;;  %v486_v33 = vmov 32  }
  0x29   :  { %109 = vmatpush1.bf16.msra.mxu0 %v373_v3  ;;  %339 = vmatpush3.bf16.msra.mxu1 %v374_v7  ;;  %v377_v10 = vld [vmem:[#allocation7 + $0x20] sm:$0xff]   ;;  %v378_v11 = vld [vmem:[#allocation7 + $0x18] sm:$0xff]   ;;  %v379_v12 = vld [vmem:[#allocation7 + $0x10] sm:$0xff]  }
  0x2a   :  { %340 = vmatprep.subr.bf16.mxu1 %v484_v1  ;;  %v380_v13 = vld [vmem:[#allocation7 + $0x8] sm:$0xff]   ;;  %v381_v14 = vld [vmem:[#allocation7] sm:$0xff]   ;;  %v72_v17 = vsub.s32 0, %v71_v16  ;;  %v76_v20 = vsub.s32 1, %v71_v16  ;;  %370 = vset.pattern.permute.xlu0 %v486_v33 }
  0x2b   :  { %v68_v18 = vld [vmem:[%s544_s2] sm:$0x3]  ;;  %s487_s2 = smov [#allocation8]  }
  0x2c   :  { %308 = vmatmul.mubr.msk.bf16.vlgmr.msra.gmra.mxu0 %vm90_vm0, %v65_v6  ;;  %v73_v19 = vrot.slane %v68_v18, %v72_v17  ;;  %v77_v23 = vrot.slane %v68_v18, %v76_v20  ;;  %v309_v34 = vld [vmem:[%s546_s4] ss:$0 sm:$0xff]  ;;  %s293_s4 = sshll.u32 %s487_s2, 4  ;;  %s294_s4 = int_to_ptr.vmem [resolvable:$true] %s293_s4 }
  0x2d   :  { %341 = vmatpush3.bf16.msra.mxu1 %v375_v8  ;;  %s450_s13 = scalar_lea.vmem %s294_s4, 128  ;;  %p455_p2 = scmp.lt.s32.totalorder %s294_s4, %s294_s4 }
  0x2e   :  { %342 = vmatprep.subr.bf16.mxu1 %v484_v1  ;;  %p451_p1 = scmp.ne.s32.totalorder %s294_s4, %s450_s13  ;;  %p456_p3 = scmp.lt.s32.totalorder %s450_s13, %s450_s13 }
  0x30   :  { %p457_p4 = por %p456_p3, %p455_p2 }
  0x31   :  { %343 = vmatpush3.bf16.msra.mxu1 %v376_v9 }
  0x32   :  { %344 = vmatprep.subr.bf16.mxu1 %v484_v1  ;;  %p458_p5 = pnand %p457_p4, %p451_p1 }
  0x35   :  { %345 = vmatpush3.bf16.msra.mxu1 %v377_v10 }
  0x36   :  { %346 = vmatprep.subr.bf16.mxu1 %v484_v1 }
  0x39   :  { %347 = vmatpush3.bf16.msra.mxu1 %v378_v11 }
  0x3a   :  { %348 = vmatprep.subr.bf16.mxu1 %v484_v1 }
  0x3d   :  { %349 = vmatpush3.bf16.msra.mxu1 %v379_v12 }
  0x3e   :  { %350 = vmatprep.subr.bf16.mxu1 %v484_v1 }
  0x41   :  { %351 = vmatpush3.bf16.msra.mxu1 %v380_v13 }
  0x42   :  { %352 = vmatprep.subr.bf16.mxu1 %v484_v1 }
  0x45   :  { %353 = vmatpush3.bf16.msra.mxu1 %v381_v14 }
  0xec   :  { %v128_v21 = vpop.f32.mrf.mxu0 }
  0xed   :  { %v129_v22 = vadd.f32 %v128_v21, %v73_v19 }
  0xee   :  { %v130_v24 = vpop.f32.mrf.mxu0 }
  0xef   :  { %v131_v26 = vadd.f32 %v130_v24, %v77_v23 }
  0xf0   :  { %v132_v25 = vpop.f32.mrf.mxu0 }
  0xf1   :  { %v133_v27 = vadd.f32 %v132_v25, %v73_v19  ;;  %v137_v30 = vmax.f32 %v131_v26, 0.0 }
  0xf2   :  { %v134_v28 = vpop.f32.mrf.mxu0 }
  0xf3   :  { %v135_v29 = vadd.f32 %v134_v28, %v77_v23 }
  0xf5   :  { %v138_v31 = vmax.f32 %v135_v29, 0.0 }
  0xf7   :  { %v139_v32 = vpack.c.bf16 %v138_v31, %v137_v30 }
  0xf9   :  { %355 = vmatmul.mubr.bf16.vlgmr.msra.gmra.mxu1 %v139_v32 }
 0x1b9   :  { %v245_v35 = vpop.f32.mrf.mxu1 }
 0x1ba   :  { %v246_v36 = vadd.f32 %v309_v34, %v245_v35 }
 0x1bb   :  { %v356_v37 = vpop.f32.mrf.mxu1 }
 0x1bc   :  { %v318_v38 = vmul.f32 -1.442695, %v246_v36 }
 0x1bd   :  { %v248_v39 = vpop.f32.mrf.mxu1 }
 0x1be   :  { %382 = vpow2.f32 %v318_v38  ;;  %v249_v40 = vadd.f32 %v309_v34, %v248_v39 }
 0x1bf   :  { %v357_v41 = vpop.f32.mrf.mxu1 }
 0x1c0   :  { %v319_v42 = vmul.f32 -1.442695, %v249_v40 }
 0x1c2   :  { %384 = vpow2.f32 %v319_v42 }
 0x1cb   :  { %v383_v43 = vpop.eup %382 }
 0x1cc   :  { %v258_v44 = vadd.f32 1.0, %v383_v43 }
 0x1ce   :  { %386 = vrcp.f32 %v258_v44 }
 0x1cf   :  { %v385_v45 = vpop.eup %384 }
 0x1d0   :  { %v259_v46 = vadd.f32 1.0, %v385_v45 }
 0x1d2   :  { %388 = vrcp.f32 %v259_v46 }
 0x1db   :  { %v387_v47 = vpop.eup %386 }
 0x1dc   :  { %266 = vperm.xlu0 %370, %v387_v47  }
 0x1df   :  { %v389_v48 = vpop.eup %388 }
 0x1e0   :  { %271 = vperm.xlu0 %370, %v389_v48  }
 0x257   :  { %v267_v49 = vpop.permute.xlu0 %266 }
 0x258   :  { %v274_v50 = vmul.f32 %v267_v49, %v246_v36 }
 0x25a   :  { %v276_v53 = vadd.f32 %v274_v50, %v129_v22 }
 0x25b   :  { %v272_v51 = vpop.permute.xlu0 %271 }
 0x25c   :  { %v275_v52 = vmul.f32 %v272_v51, %v249_v40 }
 0x25e   :  { %v277_v54 = vadd.f32 %v275_v52, %v133_v27 }
 0x260   :  { %v327_v55 = vpack.c.bf16 %v277_v54, %v276_v53 }
 0x262   :  { %328 = vst [vmem:[#allocation8] sm:$0xff] %v327_v55  }
 0x263   :  { %461 = shalt.err (!%p458_p5)
}
 0x264   :  { %299 = dma.vmem_to_hbm [thread:$0]  %s294_s4, 128, %s547_s5, [#allocation4], %s481_s1, %s481_s1, %s482_s8  }
 0x265   :  { %474 = dma.done.wait [#allocation4], 128  }
 0x266   :  { %475 = vsyncadd [#allocation4], 4294967168 }
 0x267   :  { %303 = vsyncpa [#allocation3], 1 }
 0x268   :  { %304 = vsyncpa [#allocation6], 1 }
 0x269   :  { %305 = vsyncpa [#allocation4], 1 }

</bundles_post_ra>
